<compile_context>
chip_gen: v6e
topology: v6e:2x2x1
jax: 0.10.0
libtpu: 0.0.40
codegen_flags: <defaults>
</compile_context>

<pallas_src>
import functools
import math

import jax
import jax.numpy as jnp
from jax import lax
from jax.experimental import pallas as pl
from jax.experimental.pallas import tpu as pltpu


def _round_up(x, mult):
    return ((x + mult - 1) // mult) * mult


def _kcl_tile_kernel(i_idx_ref, j_idx_ref, xi_ref, xj_ref, o_ref, *,
                     tm, m, t, gamma):
    s = pl.program_id(0)
    i = i_idx_ref[s]           # row-tile index of this step (SMEM scalar)
    j = j_idx_ref[s]           # col-tile index of this step (i <= j)

    a_i = xi_ref[0]            # (tm, d_pad) anchors,   row-tile i
    p_i = xi_ref[1]            # (tm, d_pad) positives, row-tile i
    a_j = xj_ref[0]            # (tm, d_pad) anchors,   row-tile j
    p_j = xj_ref[1]            # (tm, d_pad) positives, row-tile j

    # Contract last dims against each other -> (tm, tm); no in-kernel transpose.
    dn = (((1,), (1,)), ((), ()))
    ga = lax.dot_general(a_i, a_j, dn, preferred_element_type=jnp.float32)
    gp = lax.dot_general(p_i, p_j, dn, preferred_element_type=jnp.float32)

    two_t = 2.0 * t
    c = math.exp(-2.0 * t)          # exp(-t*(2-2g)) = c * exp(2t*g)
    e_scale = c * gamma / (m * m)   # gamma * mean over M^2 entries
    a_scale = c * 2.0 / m           # 2 * mean over M pairs

    energy = jnp.exp(two_t * ga) + jnp.exp(two_t * gp)      # (tm, tm) f32

    # Off-diagonal tile pairs stand in for their mirror image -> weight 2.
    w = jnp.where(i == j, e_scale, 2.0 * e_scale)
    col_sums = jnp.sum(energy, axis=0, keepdims=True)       # (1, tm), lane layout
    o_ref[...] = (w * col_sums)[None, :, :]

    # Paired alignment term exp(-t*||a_k - p_k||^2): diagonal tiles only,
    # computed as an elementwise mul + lane reduce (no matmul, no tm^2 exps).
    @pl.when(i == j)
    def _diag():
        prod = a_i.astype(jnp.float32) * p_i.astype(jnp.float32)
        row_dots = jnp.sum(prod, axis=1, keepdims=True)     # (tm, 1)
        al_sum = jnp.sum(jnp.exp(two_t * row_dots))         # scalar f32
        lane = lax.broadcasted_iota(jnp.int32, (1, 1, tm), 2)
        o_ref[...] -= jnp.where(lane == 0, a_scale * al_sum, 0.0)


def kcl_loss(z, *, t=2.0, gamma=16.0, block_m=256, mxu_dtype=jnp.bfloat16):
    """KCL loss (gaussian kernel). z: (2M, d) float array. Returns scalar f32.

    block_m=256 matches the v6e/v7x MXU; use block_m=128 on v5e.
    """
    two_m, d = z.shape
    m = two_m // 2
    zf = z.astype(jnp.float32)

    # --- Hoisted L2 normalization (once per row, f32). ---
    ss = jnp.sum(zf * zf, axis=1, keepdims=True)
    # x * rsqrt(max(ss, eps^2)) == x / max(||x||, eps), eps = 1e-12
    zn = zf * lax.rsqrt(jnp.maximum(ss, 1e-24))
    a = zn[:m]
    p = zn[m:2 * m]

    # Pad lane / contraction dim to a multiple of 128 (zero cols are harmless).
    d_pad = _round_up(max(d, 1), 128)
    # Row tile: multiple of 16 sublanes (bf16 packing); pad M to a tile multiple.
    tm = _round_up(min(int(block_m), _round_up(m, 16)), 16)
    itemsize = jnp.dtype(mxu_dtype).itemsize
    # Keep pipelined inputs (2 operands x 2 buffers x (2,tm,d_pad)) well under
    # the scoped-VMEM budget (v7x has only 64 MiB physical per TensorCore).
    while tm > 16 and (8 * tm * d_pad * itemsize) > (20 << 20):
        tm = _round_up(tm // 2, 16)
    m_pad = _round_up(m, tm)
    pad_rows = m_pad - m

    if d_pad != d or pad_rows:
        a = jnp.pad(a, ((0, pad_rows), (0, d_pad - d)))
        p = jnp.pad(p, ((0, pad_rows), (0, d_pad - d)))
    # Stack anchors/positives -> one array per (i-tile, j-tile) stream; pre-cast.
    x = jnp.stack([a, p], axis=0).astype(mxu_dtype)          # (2, m_pad, d_pad)

    num_t = m_pad // tm
    # Flat triangular grid over i <= j tile pairs (scalar-prefetched indices).
    tri_i, tri_j = [], []
    for bi in range(num_t):
        for bj in range(bi, num_t):
            tri_i.append(bi)
            tri_j.append(bj)
    num_flat = len(tri_i)
    i_idx = jnp.asarray(tri_i, dtype=jnp.int32)
    j_idx = jnp.asarray(tri_j, dtype=jnp.int32)

    kernel = functools.partial(_kcl_tile_kernel, tm=tm, m=m,
                               t=float(t), gamma=float(gamma))

    grid_spec = pltpu.PrefetchScalarGridSpec(
        num_scalar_prefetch=2,
        grid=(num_flat,),
        in_specs=[
            pl.BlockSpec((2, tm, d_pad), lambda s, i_ref, j_ref: (0, i_ref[s], 0)),
            pl.BlockSpec((2, tm, d_pad), lambda s, i_ref, j_ref: (0, j_ref[s], 0)),
        ],
        out_specs=pl.BlockSpec((1, 1, tm), lambda s, i_ref, j_ref: (s, 0, 0)),
    )

    partials = pl.pallas_call(
        kernel,
        out_shape=jax.ShapeDtypeStruct((num_flat, 1, tm), jnp.float32),
        grid_spec=grid_spec,
        compiler_params=pltpu.CompilerParams(
            dimension_semantics=("parallel",),
            vmem_limit_bytes=32 * 1024 * 1024),
    )(i_idx, j_idx, x, x)

    # Analytic correction for the zero-padded rows (normalized rows are zero,
    # so every padded gram entry / padded paired dot is exactly 0 -> exp(0)=1):
    #   energy over-count : e_scale * 2 * (m_pad^2 - m^2)   (two gram matrices)
    #   alignment over-sub: a_scale * (m_pad - m)
    c = math.exp(-2.0 * float(t))
    e_scale = c * float(gamma) / (m * m)
    a_scale = c * 2.0 / m
    correction = -e_scale * 2.0 * float(m_pad * m_pad - m * m) + a_scale * float(pad_rows)
    return jnp.sum(partials) + correction


def _kcl_reference(z, t=2.0, gamma=16.0):
    # Pure-JAX reference (f32, full-precision matmuls) for sanity checking.
    m = z.shape[0] // 2
    zf = z.astype(jnp.float32)
    zn = zf / jnp.maximum(jnp.linalg.norm(zf, axis=1, keepdims=True), 1e-12)
    a, p = zn[:m], zn[m:2 * m]
    ga = jnp.dot(a, a.T, precision=lax.Precision.HIGHEST)
    gp = jnp.dot(p, p.T, precision=lax.Precision.HIGHEST)
    ka = jnp.exp(-t * (2.0 - 2.0 * ga))
    kp = jnp.exp(-t * (2.0 - 2.0 * gp))
    energy = ka.mean() + kp.mean()
    alignment = 2.0 * jnp.mean(jnp.exp(-t * jnp.sum((a - p) ** 2, axis=1)))
    return -alignment + gamma * energy


if __name__ == "__main__":
    key = jax.random.PRNGKey(0)
    k1, k2, k3 = jax.random.split(key, 3)

    # Case 1: M=8 anchor/positive pairs, d=32 (single-tile path, padded rows).
    z1 = jax.random.normal(k1, (16, 32), dtype=jnp.float32)
    ref1 = jax.block_until_ready(_kcl_reference(z1, t=2.0, gamma=16.0))
    out1_f32 = jax.block_until_ready(
        kcl_loss(z1, t=2.0, gamma=16.0, mxu_dtype=jnp.float32))
    assert jnp.allclose(out1_f32, ref1, rtol=1e-4, atol=1e-4), (out1_f32, ref1)
    out1_bf16 = jax.block_until_ready(kcl_loss(z1, t=2.0, gamma=16.0))
    assert jnp.allclose(out1_bf16, ref1, rtol=5e-2, atol=5e-2), (out1_bf16, ref1)

    # Case 2: M=40, block_m=16 -> num_t=3 triangular grid (6 flat steps),
    # off-diagonal weight-2 path + padded-row analytic correction.
    z2 = jax.random.normal(k2, (80, 32), dtype=jnp.float32)
    ref2 = jax.block_until_ready(_kcl_reference(z2, t=2.0, gamma=16.0))
    out2_f32 = jax.block_until_ready(
        kcl_loss(z2, t=2.0, gamma=16.0, block_m=16, mxu_dtype=jnp.float32))
    assert jnp.allclose(out2_f32, ref2, rtol=1e-4, atol=1e-4), (out2_f32, ref2)
    out2_bf16 = jax.block_until_ready(
        kcl_loss(z2, t=2.0, gamma=16.0, block_m=16))
    assert jnp.allclose(out2_bf16, ref2, rtol=5e-2, atol=5e-2), (out2_bf16, ref2)

    # Case 3: M=64, d=100 (lane padding only, no padded rows), 2x2 tiles.
    z3 = jax.random.normal(k3, (128, 100), dtype=jnp.float32)
    ref3 = jax.block_until_ready(_kcl_reference(z3, t=2.0, gamma=16.0))
    out3_f32 = jax.block_until_ready(
        kcl_loss(z3, t=2.0, gamma=16.0, block_m=32, mxu_dtype=jnp.float32))
    assert jnp.allclose(out3_f32, ref3, rtol=1e-4, atol=1e-4), (out3_f32, ref3)

    print("KERNEL_OK")
</pallas_src>

<mosaic_0001>
module attributes {stable_mosaic.version = 11 : i64} {
  func.func @_kcl_tile_kernel(%arg0: i32, %arg1: memref<1xi32, #tpu.memory_space<smem>>, %arg2: memref<1xi32, #tpu.memory_space<smem>>, %arg3: memref<2x16x128xf32, #tpu.memory_space<vmem>>, %arg4: memref<2x16x128xf32, #tpu.memory_space<vmem>>, %arg5: memref<1x1x16xf32, #tpu.memory_space<vmem>>) attributes {dimension_semantics = [#tpu.dimension_semantics<parallel>], iteration_bounds = array<i64: 1>, scalar_prefetch = 2 : i64, scratch_operands = 0 : i64, tpu.core_type = #tpu.core_type<tc>, window_params = [{transform_indices = @transform_0, window_bounds = array<i64: 2, 16, 128>}, {transform_indices = @transform_1, window_bounds = array<i64: 2, 16, 128>}, {transform_indices = @transform_2, window_bounds = array<i64: 1, 1, 16>}]} {
    %0 = arith.index_cast %arg0 : i32 to index
    %1 = memref.load %arg1[%0] : memref<1xi32, #tpu.memory_space<smem>>
    %2 = arith.index_cast %arg0 : i32 to index
    %3 = memref.load %arg2[%2] : memref<1xi32, #tpu.memory_space<smem>>
    %c0 = arith.constant 0 : index
    %c0_0 = arith.constant 0 : index
    %c0_1 = arith.constant 0 : index
    %4 = vector.load %arg3[%c0, %c0_0, %c0_1] : memref<2x16x128xf32, #tpu.memory_space<vmem>>, vector<1x16x128xf32>
    %5 = vector.shape_cast %4 : vector<1x16x128xf32> to vector<16x128xf32>
    %c1 = arith.constant 1 : index
    %c0_2 = arith.constant 0 : index
    %c0_3 = arith.constant 0 : index
    %6 = vector.load %arg3[%c1, %c0_2, %c0_3] : memref<2x16x128xf32, #tpu.memory_space<vmem>>, vector<1x16x128xf32>
    %7 = vector.shape_cast %6 : vector<1x16x128xf32> to vector<16x128xf32>
    %c0_4 = arith.constant 0 : index
    %c0_5 = arith.constant 0 : index
    %c0_6 = arith.constant 0 : index
    %8 = vector.load %arg4[%c0_4, %c0_5, %c0_6] : memref<2x16x128xf32, #tpu.memory_space<vmem>>, vector<1x16x128xf32>
    %9 = vector.shape_cast %8 : vector<1x16x128xf32> to vector<16x128xf32>
    %c1_7 = arith.constant 1 : index
    %c0_8 = arith.constant 0 : index
    %c0_9 = arith.constant 0 : index
    %10 = vector.load %arg4[%c1_7, %c0_8, %c0_9] : memref<2x16x128xf32, #tpu.memory_space<vmem>>, vector<1x16x128xf32>
    %11 = vector.shape_cast %10 : vector<1x16x128xf32> to vector<16x128xf32>
    %cst = arith.constant dense<0.000000e+00> : vector<16x16xf32>
    %12 = tpu.matmul %5, %9, %cst {dimension_numbers = #tpu.dot_dimension_numbers<[1], [1], [0], [0], [0, 0, 1, 0], [], []>} : vector<16x128xf32>, vector<16x128xf32>, vector<16x16xf32> -> vector<16x16xf32>
    %cst_10 = arith.constant dense<0.000000e+00> : vector<16x16xf32>
    %13 = tpu.matmul %7, %11, %cst_10 {dimension_numbers = #tpu.dot_dimension_numbers<[1], [1], [0], [0], [0, 0, 1, 0], [], []>} : vector<16x128xf32>, vector<16x128xf32>, vector<16x16xf32> -> vector<16x16xf32>
    %cst_11 = arith.constant 4.000000e+00 : f32
    %14 = vector.broadcast %cst_11 : f32 to vector<16x16xf32>
    %15 = arith.mulf %14, %12 : vector<16x16xf32>
    %16 = math.exp %15 : vector<16x16xf32>
    %cst_12 = arith.constant 4.000000e+00 : f32
    %17 = vector.broadcast %cst_12 : f32 to vector<16x16xf32>
    %18 = arith.mulf %17, %13 : vector<16x16xf32>
    %19 = math.exp %18 : vector<16x16xf32>
    %20 = arith.addf %16, %19 : vector<16x16xf32>
    %21 = arith.cmpi eq, %1, %3 : i32
    %cst_13 = arith.constant 4.578910e-03 : f32
    %cst_14 = arith.constant 0.00915781967 : f32
    %22 = arith.select %21, %cst_13, %cst_14 : f32
    %cst_15 = arith.constant dense<0.000000e+00> : vector<16xf32>
    %23 = vector.multi_reduction <add>, %20, %cst_15 [0] : vector<16x16xf32> to vector<16xf32>
    %24 = vector.shape_cast %23 : vector<16xf32> to vector<1x16xf32>
    %25 = vector.broadcast %22 : f32 to vector<1x16xf32>
    %26 = arith.mulf %25, %24 : vector<1x16xf32>
    %27 = vector.shape_cast %26 : vector<1x16xf32> to vector<1x1x16xf32>
    %c0_16 = arith.constant 0 : index
    %c0_17 = arith.constant 0 : index
    %c0_18 = arith.constant 0 : index
    %28 = vector.load %arg5[%c0_16, %c0_17, %c0_18] : memref<1x1x16xf32, #tpu.memory_space<vmem>>, vector<1x1x16xf32>
    tpu.vector_store %arg5[%c0_16, %c0_17, %c0_18], %27 {strides = array<i32>} : memref<1x1x16xf32, #tpu.memory_space<vmem>>, vector<1x1x16xf32>,
    %29 = arith.cmpi eq, %1, %3 : i32
    %30 = arith.extui %29 : i1 to i32
    %c0_i32 = arith.constant 0 : i32
    %31 = arith.cmpi ne, %30, %c0_i32 : i32
    scf.if %31 {
      %32 = arith.mulf %5, %7 : vector<16x128xf32>
      %cst_19 = arith.constant dense<0.000000e+00> : vector<16xf32>
      %33 = vector.multi_reduction <add>, %32, %cst_19 [1] : vector<16x128xf32> to vector<16xf32>
      %34 = vector.shape_cast %33 : vector<16xf32> to vector<16x1xf32>
      %cst_20 = arith.constant 4.000000e+00 : f32
      %35 = vector.broadcast %cst_20 : f32 to vector<16x1xf32>
      %36 = arith.mulf %35, %34 : vector<16x1xf32>
      %37 = math.exp %36 : vector<16x1xf32>
      %38 = vector.shape_cast %37 : vector<16x1xf32> to vector<1x16x1xf32>
      %cst_21 = arith.constant dense<0.000000e+00> : vector<1xf32>
      %39 = vector.multi_reduction <add>, %38, %cst_21 [1, 2] : vector<1x16x1xf32> to vector<1xf32>
      %40 = vector.shape_cast %39 : vector<1xf32> to vector<1x1x1xf32>
      %41 = vector.extract %40[0, 0, 0] : f32 from vector<1x1x1xf32>
      %42 = tpu.iota {dimensions = array<i32: 2>} : vector<1x1x16xi32>
      %c0_22 = arith.constant 0 : index
      %c0_23 = arith.constant 0 : index
      %c0_24 = arith.constant 0 : index
      %43 = vector.load %arg5[%c0_22, %c0_23, %c0_24] : memref<1x1x16xf32, #tpu.memory_space<vmem>>, vector<1x1x16xf32>
      %c0_i32_25 = arith.constant 0 : i32
      %44 = vector.broadcast %c0_i32_25 : i32 to vector<1x1x16xi32>
      %45 = arith.cmpi eq, %42, %44 : vector<1x1x16xi32>
      %cst_26 = arith.constant 4.578910e-03 : f32
      %46 = arith.mulf %cst_26, %41 : f32
      %cst_27 = arith.constant 0.000000e+00 : f32
      %47 = vector.broadcast %46 : f32 to vector<1x1x16xf32>
      %48 = vector.broadcast %cst_27 : f32 to vector<1x1x16xf32>
      %49 = arith.select %45, %47, %48 : vector<1x1x16xi1>, vector<1x1x16xf32>
      %50 = arith.subf %43, %49 : vector<1x1x16xf32>
      %c0_28 = arith.constant 0 : index
      %c0_29 = arith.constant 0 : index
      %c0_30 = arith.constant 0 : index
      %51 = vector.load %arg5[%c0_28, %c0_29, %c0_30] : memref<1x1x16xf32, #tpu.memory_space<vmem>>, vector<1x1x16xf32>
      tpu.vector_store %arg5[%c0_28, %c0_29, %c0_30], %50 {strides = array<i32>} : memref<1x1x16xf32, #tpu.memory_space<vmem>>, vector<1x1x16xf32>,
    } else {
    }
    return
  }
  func.func @transform_0(%arg0: i32, %arg1: memref<1xi32, #tpu.memory_space<smem>>, %arg2: memref<1xi32, #tpu.memory_space<smem>>) -> (i32, i32, i32) {
    %0 = arith.index_cast %arg0 : i32 to index
    %1 = memref.load %arg1[%0] : memref<1xi32, #tpu.memory_space<smem>>
    %c0_i32 = arith.constant 0 : i32
    %c0_i32_0 = arith.constant 0 : i32
    %c0_i32_1 = arith.constant 0 : i32
    return %c0_i32, %1, %c0_i32_0 : i32, i32, i32
  }
  func.func @transform_1(%arg0: i32, %arg1: memref<1xi32, #tpu.memory_space<smem>>, %arg2: memref<1xi32, #tpu.memory_space<smem>>) -> (i32, i32, i32) {
    %0 = arith.index_cast %arg0 : i32 to index
    %1 = memref.load %arg2[%0] : memref<1xi32, #tpu.memory_space<smem>>
    %c0_i32 = arith.constant 0 : i32
    %c0_i32_0 = arith.constant 0 : i32
    %c0_i32_1 = arith.constant 0 : i32
    return %c0_i32, %1, %c0_i32_0 : i32, i32, i32
  }
  func.func @transform_2(%arg0: i32, %arg1: memref<1xi32, #tpu.memory_space<smem>>, %arg2: memref<1xi32, #tpu.memory_space<smem>>) -> (i32, i32, i32) {
    %c0_i32 = arith.constant 0 : i32
    %c0_i32_0 = arith.constant 0 : i32
    %c0_i32_1 = arith.constant 0 : i32
    return %arg0, %c0_i32, %c0_i32_0 : i32, i32, i32
  }
}

</mosaic_0001>

<bundles_post_ra>
// kernel: tpu_custom_call.1
= control target key start
LH: loop header
LB: loop body
LE: loop exit
PB: predicated region body
PF: predicated region fallthrough
CT: control target
= control target key end

     0   :  { %11 = vsyncpa [#allocation6], 0  ;;  %s494_s0 = inlined_call_operand.<no memory space> [shape: s32[1], index: 0, kind: input, shape index: {}]   ;;  %s495_s1 = inlined_call_operand.<no memory space> [shape: s32[1], index: 1, kind: input, shape index: {}]   ;;  %s496_s2 = inlined_call_operand.hbm [shape: f32[2,16,128], index: 2, kind: input, shape index: {}]   ;;  %s497_s3 = inlined_call_operand.hbm [shape: f32[2,16,128], index: 3, kind: input, shape index: {}]   ;;  %s498_s4 = inlined_call_operand.hbm [shape: f32[1,1,16], index: 4, kind: output, shape index: {}]  }
   0x1   :  { %12 = vsyncpa [#allocation9], 0 }
   0x2   :  { %13 = vsyncpa [#allocation7], 0  ;;  %s310_s17 = sshll.u32 %s494_s0, 8  ;;  %s423_s21 = smov [#allocation5]  }
   0x3   :  { %s22_s20 = scalar_lea.hbm %s496_s2, %s310_s17  ;;  %s23_s22 = sshll.u32 %s423_s21, 4  ;;  %s24_s22 = int_to_ptr.vmem [resolvable:$true] %s23_s22 }
   0x4   :  { %s311_s25 = sshll.u32 %s495_s1, 8  ;;  %s353_s26 = scalar_lea.hbm %s22_s20, 512 }
   0x5   :  { %p354_p0 = scmp.ne.s32.totalorder %s22_s20, %s353_s26  ;;  %s355_s29 = scalar_lea.hbm %s496_s2, 512 }
   0x6   :  { %p356_p1 = scmp.lt.s32.totalorder %s22_s20, %s496_s2  ;;  %p357_p2 = scmp.lt.s32.totalorder %s355_s29, %s353_s26 }
   0x8   :  { %p358_p3 = por %p357_p2, %p356_p1 }
   0xa   :  { %p359_p4 = pnand %p358_p3, %p354_p0 }
   0xc   :  { %362 = shalt.err (!%p359_p4)
}
   0xd   :  { %s363_s6 = scalar_lea.vmem %s24_s22, 512  ;;  %p368_p6 = scmp.lt.s32.totalorder %s24_s22, %s24_s22 }
   0xe   :  { %p364_p5 = scmp.ne.s32.totalorder %s24_s22, %s363_s6  ;;  %p369_p7 = scmp.lt.s32.totalorder %s363_s6, %s363_s6 }
  0x10   :  { %p370_p8 = por %p369_p7, %p368_p6 }
  0x12   :  { %p371_p9 = pnand %p370_p8, %p364_p5 }
  0x14   :  { %374 = shalt.err (!%p371_p9)
}
  0x15   :  { %s424_s7 = smov 128   ;;  %s425_s8 = smov 8  }
  0x16   :  { %29 = dma.hbm_to_vmem [thread:$0]  %s22_s20, 512, %s24_s22, [#allocation6], %s424_s7, %s424_s7, %s425_s8  }
  0x17   :  { %s38_s11 = scalar_lea.hbm %s497_s3, %s311_s25  ;;  %s426_s12 = smov [#allocation8]  }
  0x18   :  { %s39_s2 = sshll.u32 %s426_s12, 4  ;;  %s375_s13 = scalar_lea.hbm %s38_s11, 512  ;;  %s40_s2 = int_to_ptr.vmem [resolvable:$true] %s39_s2 }
  0x19   :  { %p376_p10 = scmp.ne.s32.totalorder %s38_s11, %s375_s13  ;;  %s377_s16 = scalar_lea.hbm %s497_s3, 512 }
  0x1a   :  { %p378_p11 = scmp.lt.s32.totalorder %s38_s11, %s497_s3  ;;  %p379_p12 = scmp.lt.s32.totalorder %s377_s16, %s375_s13 }
  0x1c   :  { %p380_p13 = por %p379_p12, %p378_p11 }
  0x1e   :  { %p381_p0 = pnand %p380_p13, %p376_p10 }
  0x20   :  { %384 = shalt.err (!%p381_p0)
}
  0x21   :  { %s385_s19 = scalar_lea.vmem %s40_s2, 512  ;;  %p390_p2 = scmp.lt.s32.totalorder %s40_s2, %s40_s2 }
  0x22   :  { %p386_p1 = scmp.ne.s32.totalorder %s40_s2, %s385_s19  ;;  %p391_p3 = scmp.lt.s32.totalorder %s385_s19, %s385_s19 }
  0x24   :  { %p392_p4 = por %p391_p3, %p390_p2 }
  0x26   :  { %p393_p5 = pnand %p392_p4, %p386_p1 }
  0x28   :  { %396 = shalt.err (!%p393_p5)
}
  0x29   :  { %45 = dma.hbm_to_vmem [thread:$0]  %s38_s11, 512, %s40_s2, [#allocation9], %s424_s7, %s424_s7, %s425_s8  }
  0x2a   :  { %417 = dma.done.wait [#allocation6], 512  }
  0x2b   :  { %418 = vsyncadd [#allocation6], 4294966784 }
  0x2c   :  { %419 = dma.done.wait [#allocation9], 512  }
  0x2d   :  { %420 = vsyncadd [#allocation9], 4294966784  ;;  %v64_v0 = vld [vmem:[#allocation8 + $0x8] sm:$0xff]  ;;  %v67_v1 = vld [vmem:[#allocation8 + $0x18] sm:$0xff]  ;;  %vm234_vm0 = vcmask 130048   ;;  %p232_p6 = scmp.eq.s32.totalorder %s494_s0, %s495_s1  ;;  %vm246_vm1 = vcmask 122880   ;;  %p309_p7 = scmp.ne.s32.totalorder %s494_s0, %s495_s1 }
  0x2e   :  { %v63_v2 = vld [vmem:[#allocation8] sm:$0xff]  ;;  %320 = vmatprep.subr.mxu0 %v64_v0  ;;  %327 = vmatprep.subr.mxu1 %v67_v1  ;;  %v66_v3 = vld [vmem:[#allocation8 + $0x10] sm:$0xff]  ;;  %v59_v6 = vld [vmem:[#allocation5 + $0x8] sm:$0xff] }
  0x2f   :  { %v58_v4 = vld [vmem:[#allocation5] sm:$0xff]  ;;  %v61_v5 = vld [vmem:[#allocation5 + $0x10] sm:$0xff]  ;;  %321 = vmatpush3.xpose.msra.mxu0 %v64_v0  ;;  %328 = vmatpush3.xpose.msra.mxu1 %v67_v1  ;;  %v62_v7 = vld [vmem:[#allocation5 + $0x18] sm:$0xff] }
  0x30   :  { %322 = vmatprep.subr.mxu0 %v63_v2  ;;  %329 = vmatprep.subr.mxu1 %v66_v3  ;;  %s233_s23 = scalar_select %p232_p6, 0.00457891, 0.00915782 }
  0x31   :  { %324 = vmatprep.mubr.f32.mxu0 %v58_v4  ;;  %331 = vmatprep.mubr.f32.mxu1 %v61_v5 }
  0x32   :  { %v244_v34 = vstv %s233_s23 }
  0x33   :  { %323 = vmatpush3.xpose.msra.mxu0 %v63_v2  ;;  %330 = vmatpush3.xpose.msra.mxu1 %v66_v3 }
  0x36   :  { %325 = vmatmul.mubr.f32.vlgmr.msra.gmra.mxu0 %v59_v6  ;;  %332 = vmatmul.mubr.f32.vlgmr.msra.gmra.mxu1 %v62_v7 }
  0xf6   :  { %v326_v8 = vpop.f32.mrf.mxu0  ;;  %v333_v9 = vpop.f32.mrf.mxu1 }
  0xf7   :  { %v219_v10 = vmul.f32 4.0, %v326_v8  ;;  %v225_v11 = vmul.f32 4.0, %v333_v9 }
  0xf8   :  { %v134_v12 = vpop.f32.mrf.mxu0  ;;  %v209_v13 = vpop.f32.mrf.mxu1 }
  0xf9   :  { %v222_v14 = vmul.f32 1.442695, %v219_v10  ;;  %v228_v15 = vmul.f32 1.442695, %v225_v11  ;;  %v218_v16 = vmul.f32 4.0, %v134_v12  ;;  %v224_v17 = vmul.f32 4.0, %v209_v13 }
  0xfb   :  { %341 = vpow2.f32 %v222_v14  ;;  %v220_v18 = vmul.f32 1.442695, %v218_v16  ;;  %v226_v19 = vmul.f32 1.442695, %v224_v17 }
  0xfc   :  { %343 = vpow2.f32 %v228_v15 }
  0xfd   :  { %345 = vpow2.f32 %v220_v18 }
  0xfe   :  { %347 = vpow2.f32 %v226_v19 }
 0x108   :  { %v342_v20 = vpop.eup %341 }
 0x109   :  { %v344_v21 = vpop.eup %343 }
 0x10a   :  { %v346_v22 = vpop.eup %345  ;;  %v231_v23 = vadd.f32 %v344_v21, %v342_v20 }
 0x10b   :  { %v348_v24 = vpop.eup %347 }
 0x10c   :  { %v230_v25 = vadd.f32 %v348_v24, %v346_v22  ;;  %v236_v26 = vsel %vm234_vm0, %v231_v23, 0.0 }
 0x10e   :  { %v235_v27 = vsel %vm234_vm0, %v230_v25, 0.0 }
 0x10f   :  { %v237_v28 = vadd.f32 %v236_v26, %v235_v27 }
 0x111   :  { %v238_v29 = vrot.slane %v237_v28, 4 }
 0x113   :  { %v239_v30 = vadd.f32 %v238_v29, %v237_v28 }
 0x115   :  { %v240_v31 = vrot.slane %v239_v30, 2 }
 0x117   :  { %v241_v32 = vadd.f32 %v240_v31, %v239_v30 }
 0x119   :  { %v242_v33 = vrot.slane %v241_v32, 1 }
 0x11b   :  { %v243_v35 = vadd.f32 %v242_v33, %v241_v32  ;;  %250 = sbr.rel (%p309_p7) target bundleno = 660 (0x294), region = 21 }
 0x11d   :  { %v245_v36 = vmul.f32 %v244_v34, %v243_v35 }
 0x11f   :  { %247 = vst.msk [vmem:[#allocation10] sm:$0x1] %vm246_vm1, %v245_v36 }
 0x120   :  { %v251_v37 = vmul.f32 %v61_v5, %v58_v4  ;;  %v252_v38 = vmul.f32 %v62_v7, %v59_v6  ;;  %vm263_vm2 = vcmask 7168   ;;  %v276_v57 = vlaneseq }
 0x122   :  { %253 = vadd.xlane.f32.xlu0 %v251_v37  ;;  %v277_v58 = vand.u32 127, %v276_v57 }
 0x124   :  { %vm279_vm3 = vcmp.eq.s32.totalorder %v277_v58, 0 }
 0x126   :  { %255 = vadd.xlane.f32.xlu0 %v252_v38  ;;  %v278_v59 = vld [vmem:[#allocation10] sm:$0x1] }
 0x1ab   :  { %v254_v39 = vpop.xlane.xlu0 %253 }
 0x1ac   :  { %v257_v40 = vmul.f32 4.0, %v254_v39 }
 0x1ae   :  { %v259_v41 = vmul.f32 1.442695, %v257_v40 }
 0x1af   :  { %v256_v42 = vpop.xlane.xlu0 %255 }
 0x1b0   :  { %v258_v43 = vmul.f32 4.0, %v256_v42  ;;  %349 = vpow2.f32 %v259_v41 }
 0x1b2   :  { %v261_v44 = vmul.f32 1.442695, %v258_v43 }
 0x1b4   :  { %351 = vpow2.f32 %v261_v44 }
 0x1bd   :  { %v350_v45 = vpop.eup %349 }
 0x1be   :  { %v264_v47 = vsel %vm263_vm2, %v350_v45, 0.0 }
 0x1c1   :  { %v352_v46 = vpop.eup %351 }
 0x1c2   :  { %v265_v48 = vsel %vm263_vm2, %v352_v46, 0.0 }
 0x1c3   :  { %v266_v49 = vadd.f32 %v265_v48, %v264_v47 }
 0x1c5   :  { %267 = vadd.xlane.f32.xlu1 %v266_v49 }
 0x24e   :  { %v268_v50 = vpop.xlane.xlu1 %267 }
 0x24f   :  { %v269_v51 = vrot.slane %v268_v50, 4 }
 0x251   :  { %v270_v52 = vadd.f32 %v269_v51, %v268_v50 }
 0x253   :  { %v271_v53 = vrot.slane %v270_v52, 2 }
 0x255   :  { %v272_v54 = vadd.f32 %v271_v53, %v270_v52 }
 0x257   :  { %v273_v55 = vrot.slane %v272_v54, 1 }
 0x259   :  { %v274_v56 = vadd.f32 %v273_v55, %v272_v54 }
 0x25b   :  { %334 = vpush %v274_v56 }
 0x28c   :  { %s335_s0 = spop %334 }
 0x28d   :  { %s280_s1 = smul.f32 0.00457891, %s335_s0 }
 0x28f   :  { %v281_v60 = vstv %s280_s1 }
 0x290   :  { %v282_v61 = vsel %vm279_vm3, %v281_v60, 0.0 }
 0x291   :  { %v283_v62 = vsub.f32 %v278_v59, %v282_v61 }
 0x293   :  { %284 = vst.msk [vmem:[#allocation10] sm:$0x1] %vm246_vm1, %v283_v62 }
 0x294 PF:  { %s427_s28 = smov [#allocation10]  }
 0x295   :  { %s291_s29 = sshll.u32 %s427_s28, 4  ;;  %s292_s29 = int_to_ptr.vmem [resolvable:$true] %s291_s29 }
 0x296   :  { %s397_s30 = scalar_lea.vmem %s292_s29, 16  ;;  %s401_s5 = scalar_lea.vmem %s292_s29, 32 }
 0x297   :  { %p398_p8 = scmp.ne.s32.totalorder %s292_s29, %s397_s30  ;;  %p402_p9 = scmp.lt.s32.totalorder %s292_s29, %s292_s29 }
 0x298   :  { %p403_p10 = scmp.lt.s32.totalorder %s401_s5, %s397_s30 }
 0x29a   :  { %p404_p11 = por %p403_p10, %p402_p9 }
 0x29c   :  { %p405_p12 = pnand %p404_p11, %p398_p8 }
 0x29e   :  { %408 = shalt.err (!%p405_p12)
}
 0x29f   :  { %294 = dma.vmem_to_hbm [thread:$0]  %s292_s29, 16, %s498_s4, [#allocation7]  }
 0x2a0   :  { %421 = dma.done.wait [#allocation7], 16  }
 0x2a1   :  { %422 = vsyncadd [#allocation7], 4294967280 }
 0x2a2   :  { %298 = vsyncpa [#allocation6], 1 }
 0x2a3   :  { %299 = vsyncpa [#allocation9], 1 }
 0x2a4   :  { %300 = vsyncpa [#allocation7], 1 }

</bundles_post_ra>
